<compile_context>
chip_gen: v7x
topology: tpu7x:2x2x1
jax: 0.10.0
libtpu: 0.0.40
codegen_flags: <defaults>
</compile_context>

<pallas_src>
import functools

import jax
import jax.numpy as jnp
from jax.experimental import pallas as pl
from jax.experimental.pallas import tpu as pltpu


def _focal_loss_kernel(x_ref, t_ref, o_ref, *, gamma, n_total, tile_n):
    pid = pl.program_id(0)
    last = pl.num_programs(0) - 1

    @pl.when(pid == 0)
    def _init():
        o_ref[...] = jnp.zeros_like(o_ref)

    x = x_ref[...].astype(jnp.float32)      # (tile_n, C) logits (bf16 cast on load)
    t = t_ref[...]                          # (tile_n, 1) int32 target class ids

    # Numerically stable log-sum-exp along the class (lane) dim.
    m = jnp.max(x, axis=-1, keepdims=True)
    shifted = x - m
    lse = jnp.log(jnp.sum(jnp.exp(shifted), axis=-1, keepdims=True))   # (tile_n, 1)

    # Pick the target class's shifted logit (cheap VPU compare + XLU reduce,
    # done BEFORE any per-element transcendental beyond the one exp needed for lse).
    col = jax.lax.broadcasted_iota(jnp.int32, shifted.shape, 1)
    shifted_t = jnp.sum(jnp.where(col == t, shifted, 0.0), axis=-1, keepdims=True)

    logp_t = shifted_t - lse                # (tile_n, 1) = log p_target
    p_t = jnp.exp(logp_t)                   # one EUP exp per row
    one_minus_p = jnp.maximum(1.0 - p_t, 0.0)   # clamp: avoid NaN if p rounds > 1

    if float(gamma) == int(gamma):
        mod = jax.lax.integer_pow(one_minus_p, int(gamma))   # VPU multiplies only
    else:
        mod = one_minus_p ** gamma                            # fractional gamma fallback
    focal_t = mod * logp_t                  # (tile_n, 1)

    # Mask padded remainder rows of the last tile so the sum stays exact.
    row = jax.lax.broadcasted_iota(jnp.int32, focal_t.shape, 0) + pid * tile_n
    contrib = jnp.where(row < n_total, focal_t, 0.0)

    # Accumulate partial sum in the resident (1,1) output block.
    o_ref[...] += jnp.sum(contrib, axis=0, keepdims=True)

    @pl.when(pid == last)
    def _finalize():
        # nll_loss negation + 'mean' reduction.
        o_ref[...] = -o_ref[...] * (1.0 / n_total)


def focal_loss(logits, targets, gamma=2.0, tile_n=512):
    """logits: (N, C) float (f32 or bf16); targets: (N,) int. Returns scalar mean focal loss."""
    n, c = logits.shape
    # tile_n must be a multiple of 8 (sublane constraint); for small N use the whole array.
    tile = n if n <= tile_n else tile_n
    grid_n = pl.cdiv(n, tile)

    t2d = targets.astype(jnp.int32).reshape(n, 1)

    kernel = functools.partial(_focal_loss_kernel, gamma=gamma, n_total=n, tile_n=tile)

    out = pl.pallas_call(
        kernel,
        out_shape=jax.ShapeDtypeStruct((1, 1), jnp.float32),
        grid_spec=pltpu.PrefetchScalarGridSpec(
            num_scalar_prefetch=0,
            grid=(grid_n,),
            in_specs=[
                pl.BlockSpec((tile, c), lambda i: (i, 0)),
                pl.BlockSpec((tile, 1), lambda i: (i, 0)),
            ],
            out_specs=pl.BlockSpec((1, 1), lambda i: (0, 0)),
        ),
        compiler_params=pltpu.CompilerParams(
            dimension_semantics=("arbitrary",),      # grid axis is a reduction
            vmem_limit_bytes=64 * 1024 * 1024,
        ),
    )(logits, t2d)   # note: no f32 up-cast here — bf16 logits stay bf16 over HBM
    return out[0, 0]


def _reference_focal_loss(logits, targets, gamma=2.0):
    log_prob = jax.nn.log_softmax(logits.astype(jnp.float32), axis=-1)
    prob = jnp.exp(log_prob)
    focal = (1.0 - prob) ** gamma * log_prob
    picked = jnp.take_along_axis(focal, targets[:, None].astype(jnp.int32), axis=-1)[:, 0]
    return -jnp.mean(picked)


if __name__ == "__main__":
    key = jax.random.PRNGKey(0)
    k1, k2, k3, k4 = jax.random.split(key, 4)

    # Case 1: tiny single-tile shape (batch=8, classes=32).
    N1, C1 = 8, 32
    logits1 = jax.random.normal(k1, (N1, C1), dtype=jnp.float32)
    targets1 = jax.random.randint(k2, (N1,), 0, C1, dtype=jnp.int32)
    loss1 = focal_loss(logits1, targets1, gamma=2.0)
    jax.block_until_ready(loss1)
    ref1 = _reference_focal_loss(logits1, targets1, gamma=2.0)
    assert jnp.allclose(loss1, ref1, atol=1e-5, rtol=1e-5), (loss1, ref1)

    # Case 2: multi-tile grid with a ragged last tile (N=20 rows, 8-row tiles -> 3 steps).
    N2, C2 = 20, 32
    logits2 = jax.random.normal(k3, (N2, C2), dtype=jnp.float32)
    targets2 = jax.random.randint(k4, (N2,), 0, C2, dtype=jnp.int32)
    loss2 = focal_loss(logits2, targets2, gamma=2.0, tile_n=8)
    jax.block_until_ready(loss2)
    ref2 = _reference_focal_loss(logits2, targets2, gamma=2.0)
    assert jnp.allclose(loss2, ref2, atol=1e-5, rtol=1e-5), (loss2, ref2)

    print("KERNEL_OK")
</pallas_src>

<mosaic_0001>
module attributes {stable_mosaic.version = 11 : i64} {
  func.func @_focal_loss_kernel(%arg0: i32, %arg1: memref<8x32xf32, #tpu.memory_space<vmem>>, %arg2: memref<8x1xi32, #tpu.memory_space<vmem>>, %arg3: memref<1x1xf32, #tpu.memory_space<vmem>>) attributes {dimension_semantics = [#tpu.dimension_semantics<arbitrary>], iteration_bounds = array<i64: 1>, scalar_prefetch = 0 : i64, scratch_operands = 0 : i64, tpu.core_type = #tpu.core_type<tc>, window_params = [{transform_indices = @transform_0, window_bounds = array<i64: 8, 32>}, {transform_indices = @transform_1, window_bounds = array<i64: 8, 1>}, {pipeline_mode = #tpu.pipeline_mode<synchronous>, transform_indices = @transform_2, window_bounds = array<i64: 1, 1>}]} {
    %c0_i32 = arith.constant 0 : i32
    %0 = arith.cmpi eq, %arg0, %c0_i32 : i32
    %1 = arith.extui %0 : i1 to i32
    %c0_i32_0 = arith.constant 0 : i32
    %2 = arith.cmpi ne, %1, %c0_i32_0 : i32
    scf.if %2 {
      %cst_18 = arith.constant 0.000000e+00 : f32
      %44 = vector.broadcast %cst_18 : f32 to vector<1x1xf32>
      %c0_19 = arith.constant 0 : index
      %c0_20 = arith.constant 0 : index
      %45 = vector.load %arg3[%c0_19, %c0_20] : memref<1x1xf32, #tpu.memory_space<vmem>>, vector<1x1xf32>
      tpu.vector_store %arg3[%c0_19, %c0_20], %44 {strides = array<i32>} : memref<1x1xf32, #tpu.memory_space<vmem>>, vector<1x1xf32>,
    } else {
    }
    %c0 = arith.constant 0 : index
    %c0_1 = arith.constant 0 : index
    %3 = vector.load %arg1[%c0, %c0_1] : memref<8x32xf32, #tpu.memory_space<vmem>>, vector<8x32xf32>
    %c0_2 = arith.constant 0 : index
    %c0_3 = arith.constant 0 : index
    %4 = vector.load %arg2[%c0_2, %c0_3] : memref<8x1xi32, #tpu.memory_space<vmem>>, vector<8x1xi32>
    %cst = arith.constant dense<0xFF800000> : vector<8xf32>
    %5 = vector.multi_reduction <maximumf>, %3, %cst [1] : vector<8x32xf32> to vector<8xf32>
    %6 = vector.shape_cast %5 : vector<8xf32> to vector<8x1xf32>
    %7 = vector.broadcast %6 : vector<8x1xf32> to vector<8x32xf32>
    %8 = arith.subf %3, %7 : vector<8x32xf32>
    %9 = math.exp %8 : vector<8x32xf32>
    %cst_4 = arith.constant dense<0.000000e+00> : vector<8xf32>
    %10 = vector.multi_reduction <add>, %9, %cst_4 [1] : vector<8x32xf32> to vector<8xf32>
    %11 = vector.shape_cast %10 : vector<8xf32> to vector<8x1xf32>
    %12 = math.log %11 : vector<8x1xf32>
    %13 = tpu.iota {dimensions = array<i32: 1>} : vector<8x32xi32>
    %14 = vector.broadcast %4 : vector<8x1xi32> to vector<8x32xi32>
    %15 = arith.cmpi eq, %13, %14 : vector<8x32xi32>
    %cst_5 = arith.constant 0.000000e+00 : f32
    %16 = vector.broadcast %cst_5 : f32 to vector<8x32xf32>
    %17 = arith.select %15, %8, %16 : vector<8x32xi1>, vector<8x32xf32>
    %cst_6 = arith.constant dense<0.000000e+00> : vector<8xf32>
    %18 = vector.multi_reduction <add>, %17, %cst_6 [1] : vector<8x32xf32> to vector<8xf32>
    %19 = vector.shape_cast %18 : vector<8xf32> to vector<8x1xf32>
    %20 = arith.subf %19, %12 : vector<8x1xf32>
    %21 = math.exp %20 : vector<8x1xf32>
    %cst_7 = arith.constant 1.000000e+00 : f32
    %22 = vector.broadcast %cst_7 : f32 to vector<8x1xf32>
    %23 = arith.subf %22, %21 : vector<8x1xf32>
    %cst_8 = arith.constant 0.000000e+00 : f32
    %24 = vector.broadcast %cst_8 : f32 to vector<8x1xf32>
    %25 = arith.maximumf %23, %24 : vector<8x1xf32>
    %26 = arith.mulf %25, %25 : vector<8x1xf32>
    %27 = arith.mulf %26, %20 : vector<8x1xf32>
    %28 = tpu.iota {dimensions = array<i32: 0>} : vector<8x1xi32>
    %c8_i32 = arith.constant 8 : i32
    %29 = arith.muli %arg0, %c8_i32 : i32
    %30 = vector.broadcast %29 : i32 to vector<8x1xi32>
    %31 = arith.addi %28, %30 : vector<8x1xi32>
    %c8_i32_9 = arith.constant 8 : i32
    %32 = vector.broadcast %c8_i32_9 : i32 to vector<8x1xi32>
    %33 = arith.cmpi slt, %31, %32 : vector<8x1xi32>
    %cst_10 = arith.constant 0.000000e+00 : f32
    %34 = vector.broadcast %cst_10 : f32 to vector<8x1xf32>
    %35 = arith.select %33, %27, %34 : vector<8x1xi1>, vector<8x1xf32>
    %c0_11 = arith.constant 0 : index
    %c0_12 = arith.constant 0 : index
    %36 = vector.load %arg3[%c0_11, %c0_12] : memref<1x1xf32, #tpu.memory_space<vmem>>, vector<1x1xf32>
    %cst_13 = arith.constant dense<0.000000e+00> : vector<1xf32>
    %37 = vector.multi_reduction <add>, %35, %cst_13 [0] : vector<8x1xf32> to vector<1xf32>
    %38 = vector.shape_cast %37 : vector<1xf32> to vector<1x1xf32>
    %39 = arith.addf %36, %38 : vector<1x1xf32>
    %c0_14 = arith.constant 0 : index
    %c0_15 = arith.constant 0 : index
    %40 = vector.load %arg3[%c0_14, %c0_15] : memref<1x1xf32, #tpu.memory_space<vmem>>, vector<1x1xf32>
    tpu.vector_store %arg3[%c0_14, %c0_15], %39 {strides = array<i32>} : memref<1x1xf32, #tpu.memory_space<vmem>>, vector<1x1xf32>,
    %c0_i32_16 = arith.constant 0 : i32
    %41 = arith.cmpi eq, %arg0, %c0_i32_16 : i32
    %42 = arith.extui %41 : i1 to i32
    %c0_i32_17 = arith.constant 0 : i32
    %43 = arith.cmpi ne, %42, %c0_i32_17 : i32
    scf.if %43 {
      %c0_18 = arith.constant 0 : index
      %c0_19 = arith.constant 0 : index
      %44 = vector.load %arg3[%c0_18, %c0_19] : memref<1x1xf32, #tpu.memory_space<vmem>>, vector<1x1xf32>
      %cst_20 = arith.constant 0.000000e+00 : f32
      %45 = vector.broadcast %cst_20 : f32 to vector<1x1xf32>
      %46 = arith.subf %45, %44 : vector<1x1xf32>
      %cst_21 = arith.constant 1.250000e-01 : f32
      %47 = vector.broadcast %cst_21 : f32 to vector<1x1xf32>
      %48 = arith.mulf %46, %47 : vector<1x1xf32>
      %c0_22 = arith.constant 0 : index
      %c0_23 = arith.constant 0 : index
      %49 = vector.load %arg3[%c0_22, %c0_23] : memref<1x1xf32, #tpu.memory_space<vmem>>, vector<1x1xf32>
      tpu.vector_store %arg3[%c0_22, %c0_23], %48 {strides = array<i32>} : memref<1x1xf32, #tpu.memory_space<vmem>>, vector<1x1xf32>,
    } else {
    }
    return
  }
  func.func @transform_0(%arg0: i32) -> (i32, i32) {
    %c0_i32 = arith.constant 0 : i32
    %c0_i32_0 = arith.constant 0 : i32
    return %arg0, %c0_i32 : i32, i32
  }
  func.func @transform_1(%arg0: i32) -> (i32, i32) {
    %c0_i32 = arith.constant 0 : i32
    %c0_i32_0 = arith.constant 0 : i32
    return %arg0, %c0_i32 : i32, i32
  }
  func.func @transform_2(%arg0: i32) -> (i32, i32) {
    %c0_i32 = arith.constant 0 : i32
    %c0_i32_0 = arith.constant 0 : i32
    %c0_i32_1 = arith.constant 0 : i32
    return %c0_i32, %c0_i32_0 : i32, i32
  }
}

</mosaic_0001>

<bundles_post_ra>
// kernel: tpu_custom_call.1
= control target key start
LH: loop header
LB: loop body
LE: loop exit
PB: predicated region body
PF: predicated region fallthrough
CT: control target
= control target key end

     0   :  { %7 = vsyncpa [#allocation3], 0  ;;  %s259_s0 = inlined_call_operand.hbm [shape: f32[8,32], index: 0, kind: input, shape index: {}]   ;;  %s260_s1 = inlined_call_operand.hbm [shape: s32[8,1], index: 1, kind: input, shape index: {}]   ;;  %s261_s2 = inlined_call_operand.hbm [shape: f32[1,1], index: 2, kind: output, shape index: {}]  }
   0x1   :  { %8 = vsyncpa [#allocation6], 0 }
   0x2   :  { %9 = vsyncpa [#allocation4], 0  ;;  %s197_s9 = smov [#allocation2]   ;;  %s198_s11 = smov [#allocation5]  }
   0x3   :  { %s16_s10 = sshll.u32 %s197_s9, 4  ;;  %s26_s12 = sshll.u32 %s198_s11, 4  ;;  %s17_s10 = int_to_ptr.vmem [resolvable:$true] %s16_s10  ;;  %s27_s12 = int_to_ptr.vmem [resolvable:$true] %s26_s12 }
   0x4   :  { %s125_s15 = scalar_lea.hbm %s259_s0, 128 }
   0x5   :  { %p126_p0 = scmp.ne.s32.totalorder %s259_s0, %s125_s15  ;;  %p129_p1 = scmp.lt.u32.totalorder %s125_s15, %s259_s0 }
   0x7   :  { %p131_p2 = pnand %p129_p1, %p126_p0 }
   0x9   :  { %134 = shalt.err (!%p131_p2)
}
   0xa   :  { %s135_s20 = scalar_lea.vmem %s17_s10, 128  ;;  %p140_p4 = scmp.lt.s32.totalorder %s17_s10, %s17_s10 }
   0xb   :  { %p136_p3 = scmp.ne.s32.totalorder %s17_s10, %s135_s20  ;;  %p141_p5 = scmp.lt.s32.totalorder %s135_s20, %s135_s20 }
   0xd   :  { %p142_p6 = por %p141_p5, %p140_p4 }
   0xf   :  { %p143_p7 = pnand %p142_p6, %p136_p3 }
  0x11   :  { %146 = shalt.err (!%p143_p7)
}
  0x12   :  { %19 = dma.hbm_to_vmem [thread:$0]  %s259_s0, 128, %s17_s10, [#allocation3]  }
  0x13   :  { %s147_s25 = scalar_lea.hbm %s260_s1, 128 }
  0x14   :  { %p148_p8 = scmp.ne.s32.totalorder %s260_s1, %s147_s25  ;;  %p151_p9 = scmp.lt.u32.totalorder %s147_s25, %s260_s1 }
  0x16   :  { %p153_p10 = pnand %p151_p9, %p148_p8 }
  0x18   :  { %156 = shalt.err (!%p153_p10)
}
  0x19   :  { %s157_s30 = scalar_lea.vmem %s27_s12, 128  ;;  %p162_p12 = scmp.lt.s32.totalorder %s27_s12, %s27_s12 }
  0x1a   :  { %p158_p11 = scmp.ne.s32.totalorder %s27_s12, %s157_s30  ;;  %p163_p13 = scmp.lt.s32.totalorder %s157_s30, %s157_s30 }
  0x1c   :  { %p164_p0 = por %p163_p13, %p162_p12 }
  0x1e   :  { %p165_p1 = pnand %p164_p0, %p158_p11 }
  0x20   :  { %168 = shalt.err (!%p165_p1)
}
  0x21   :  { %29 = dma.hbm_to_vmem [thread:$0]  %s260_s1, 128, %s27_s12, [#allocation6]  }
  0x22   :  { %191 = dma.done.wait [#allocation3], 128  }
  0x23   :  { %192 = vsyncadd [#allocation3], 4294967168 }
  0x24   :  { %193 = dma.done.wait [#allocation6], 128  }
  0x25   :  { %194 = vsyncadd [#allocation6], 4294967168  ;;  %v199_v0 = vmov 0   ;;  %vm44_vm0 = vcmask 261120   ;;  %v42_v1 = vld [vmem:[#allocation2] sm:$0xff]  ;;  %v43_v3 = vld [vmem:[#allocation5] sm:$0xff]  ;;  %v56_v7 = vlaneseq }
  0x26   :  { %118 = vset.pattern.permute.xlu0 %v199_v0  ;;  %v45_v2 = vsel %vm44_vm0, %v42_v1, -inf  ;;  %vm40_vm2 = vcmask 0   ;;  %v200_v14 = vmov 0.0   ;;  %s201_s1 = smov [#allocation7]  }
  0x27   :  { %46 = vmax.xlane.f32.xlu0 %v45_v2  ;;  %v57_v8 = vand.u32 127, %v56_v7  ;;  %41 = vst.msk [vmem:[#allocation7] sm:$0x1] %vm40_vm2, %v200_v14  ;;  %s103_s4 = sshll.u32 %s201_s1, 4  ;;  %s104_s4 = int_to_ptr.vmem [resolvable:$true] %s103_s4 }
  0x28   :  { %s169_s5 = scalar_lea.vmem %s104_s4, 16  ;;  %s173_s6 = scalar_lea.vmem %s104_s4, 32 }
  0x29   :  { %p170_p2 = scmp.ne.s32.totalorder %s104_s4, %s169_s5  ;;  %p174_p3 = scmp.lt.s32.totalorder %s104_s4, %s104_s4 }
  0x2a   :  { %p175_p4 = scmp.lt.s32.totalorder %s173_s6, %s169_s5 }
  0x2c   :  { %p176_p5 = por %p175_p4, %p174_p3 }
  0x2e   :  { %v80_v31 = vld [vmem:[#allocation7] sm:$0x1]  ;;  %p177_p6 = pnand %p176_p5, %p170_p2 }
  0x3d   :  { %59 = vperm.xlu0 %118, %v43_v3  }
  0xb4   :  { %v47_v4 = vpop.xlane.xlu0 %46 }
  0xb5   :  { %v48_v5 = vsub.f32 %v42_v1, %v47_v4 }
  0xb7   :  { %v49_v6 = vmul.f32 1.442695, %v48_v5 }
  0xb9   :  { %119 = vpow2.f32 %v49_v6 }
  0xbc   :  { %v60_v9 = vpop.permute.xlu0 %59 }
  0xbd   :  { %vm61_vm1 = vcmp.eq.s32.totalorder %v57_v8, %v60_v9 }
  0xbe   :  { %v62_v12 = vsel %vm61_vm1, %v48_v5, 0.0 }
  0xbf   :  { %v63_v13 = vsel %vm44_vm0, %v62_v12, 0.0 }
  0xc3   :  { %v120_v10 = vpop.eup %119 }
  0xc4   :  { %v51_v11 = vsel %vm44_vm0, %v120_v10, 0.0 }
  0xc5   :  { %52 = vadd.xlane.f32.xlu1 %v51_v11 }
  0xc9   :  { %64 = vadd.xlane.f32.xlu1 %v63_v13 }
 0x152   :  { %v53_v15 = vpop.xlane.xlu1 %52 }
 0x153   :  { %121 = vlog2.f32 %v53_v15 }
 0x156   :  { %v65_v18 = vpop.xlane.xlu1 %64 }
 0x15d   :  { %v122_v16 = vpop.eup %121 }
 0x15e   :  { %v55_v17 = vmul.f32 0.6931472, %v122_v16 }
 0x160   :  { %v66_v19 = vsub.f32 %v65_v18, %v55_v17 }
 0x162   :  { %v67_v20 = vmul.f32 1.442695, %v66_v19 }
 0x164   :  { %123 = vpow2.f32 %v67_v20 }
 0x16e   :  { %v124_v21 = vpop.eup %123 }
 0x16f   :  { %v69_v22 = vsub.f32 1.0, %v124_v21 }
 0x171   :  { %v70_v23 = vmax.f32 %v69_v22, 0.0 }
 0x173   :  { %v71_v24 = vmul.f32 %v70_v23, %v70_v23 }
 0x175   :  { %v72_v25 = vmul.f32 %v71_v24, %v66_v19 }
 0x177   :  { %v81_v26 = vrot.slane %v72_v25, 4 }
 0x179   :  { %v82_v27 = vadd.f32 %v81_v26, %v72_v25 }
 0x17b   :  { %v83_v28 = vrot.slane %v82_v27, 2 }
 0x17d   :  { %v84_v29 = vadd.f32 %v83_v28, %v82_v27 }
 0x17f   :  { %v85_v30 = vrot.slane %v84_v29, 1 }
 0x181   :  { %v86_v32 = vadd.f32 %v85_v30, %v84_v29 }
 0x183   :  { %v87_v33 = vadd.f32 %v86_v32, %v80_v31 }
 0x185   :  { %89 = vst.msk [vmem:[#allocation7] sm:$0x1] %vm40_vm2, %v87_v33 }
 0x18c   :  { %v93_v34 = vld [vmem:[#allocation7] sm:$0x1] }
 0x18d   :  { %v94_v35 = vsub.f32 0.0, %v93_v34 }
 0x18f   :  { %v95_v36 = vmul.f32 0.125, %v94_v35 }
 0x191   :  { %96 = vst.msk [vmem:[#allocation7] sm:$0x1] %vm40_vm2, %v95_v36 }
 0x192   :  { %180 = shalt.err (!%p177_p6)
}
 0x193   :  { %s181_s9 = scalar_lea.hbm %s261_s2, 16 }
 0x194   :  { %p182_p7 = scmp.ne.s32.totalorder %s261_s2, %s181_s9  ;;  %p185_p8 = scmp.lt.u32.totalorder %s181_s9, %s261_s2 }
 0x196   :  { %p187_p9 = pnand %p185_p8, %p182_p7 }
 0x198   :  { %190 = shalt.err (!%p187_p9)
}
 0x199   :  { %106 = dma.vmem_to_hbm [thread:$0]  %s104_s4, 16, %s261_s2, [#allocation4]  }
 0x19a   :  { %195 = dma.done.wait [#allocation4], 16  }
 0x19b   :  { %196 = vsyncadd [#allocation4], 4294967280 }
 0x19c   :  { %110 = vsyncpa [#allocation3], 1 }
 0x19d   :  { %111 = vsyncpa [#allocation6], 1 }
 0x19e   :  { %112 = vsyncpa [#allocation4], 1 }

</bundles_post_ra>
